<compile_context>
chip_gen: v6e
topology: v6e:2x2x1
jax: 0.10.0
libtpu: 0.0.40
codegen_flags: <defaults>
</compile_context>

<pallas_src>
import jax
import jax.numpy as jnp
from jax.experimental import pallas as pl
from jax.experimental.pallas import tpu as pltpu


# --------------------------------------------------------------------------------------
# helpers
# --------------------------------------------------------------------------------------
def _round_up(v, m):
    return (v + m - 1) // m * m


def _sublane_multiple(dtype):
    # sublane packing: f32 -> 8, bf16 -> 16, int8/fp8 -> 32
    return {4: 8, 2: 16, 1: 32}.get(jnp.dtype(dtype).itemsize, 8)


def _vmem_capacity_bytes():
    # Generation-aware physical VMEM; fall back to the smallest (v7x, 64 MiB) if unqueryable.
    try:
        return int(pltpu.get_tpu_info().vmem_capacity_bytes)
    except Exception:
        return 64 << 20


# --------------------------------------------------------------------------------------
# kernels
# --------------------------------------------------------------------------------------
def _fused_resident_kernel(x_ref, w_ref, b_ref, o_ref):
    # one MXU matmul (pre-folded weight) + bias epilogue, f32 accumulation
    acc = jnp.dot(x_ref[...], w_ref[...], preferred_element_type=jnp.float32)
    o_ref[...] = (acc + b_ref[...]).astype(o_ref.dtype)


def _two_stage_kernel(x_ref, w1_ref, w2_ref, b_ref, o_ref):
    # genuinely low-rank path: two chained matmuls; intermediate h stays in vregs/VMEM
    h = jnp.dot(x_ref[...], w1_ref[...], preferred_element_type=jnp.float32)
    acc = jnp.dot(h.astype(w2_ref.dtype), w2_ref[...], preferred_element_type=jnp.float32)
    o_ref[...] = (acc + b_ref[...]).astype(o_ref.dtype)


def _fused_tiled_kernel(x_ref, w_ref, b_ref, o_ref, acc_ref):
    # grid = (batch, n, m_contraction); contraction axis is innermost and "arbitrary"
    k = pl.program_id(2)

    @pl.when(k == 0)
    def _():
        acc_ref[...] = jnp.zeros_like(acc_ref)

    acc_ref[...] += jnp.dot(x_ref[...], w_ref[...], preferred_element_type=jnp.float32)

    @pl.when(k == pl.num_programs(2) - 1)
    def _():
        o_ref[...] = (acc_ref[...] + b_ref[...]).astype(o_ref.dtype)


# --------------------------------------------------------------------------------------
# host-side weight preparation (once per model, hoisted out of the forward path)
# --------------------------------------------------------------------------------------
def prepare_decomposed_linear(first_w, second_w, second_b=None, *,
                              compute_dtype=None, fold=None):
    """first_w: [K, M] (= first.weight), second_w: [N, K] (= second.weight), second_b: [N]|None."""
    K, M = first_w.shape
    N, K2 = second_w.shape
    assert K2 == K

    # bf16-native MXU on v5e/v6e/v7x: default to bf16 inputs with f32 accumulation.
    cdtype = jnp.dtype(jnp.bfloat16) if compute_dtype is None else jnp.dtype(compute_dtype)

    # minimal rank padding: sublane multiple of the compute dtype (NOT 128)
    Kp = _round_up(K, _sublane_multiple(cdtype))

    if fold is None:
        # fold the two factors into one matmul only when the (minimally padded) rank
        # no longer saves MXU / DMA work
        fold = Kp * (M + N) >= M * N

    w1t = first_w.T.astype(jnp.float32)     # [M, K]
    w2t = second_w.T.astype(jnp.float32)    # [K, N]
    bias = second_b if second_b is not None else jnp.zeros((N,), jnp.float32)
    b = bias.astype(jnp.float32).reshape(1, N)

    if fold:
        # pre-fold once at init in f32, store in compute dtype
        w_eff = jnp.dot(w1t, w2t, preferred_element_type=jnp.float32)   # [M, N]
        params = dict(mode="fused", w=w_eff.astype(cdtype), b=b)
    else:
        w1 = jnp.zeros((M, Kp), cdtype).at[:, :K].set(w1t.astype(cdtype))   # [M, Kp]
        w2 = jnp.zeros((Kp, N), cdtype).at[:K, :].set(w2t.astype(cdtype))   # [Kp, N]
        params = dict(mode="two_stage", w1=w1, w2=w2, b=b)

    params.update(M=M, N=N, K=K, compute_dtype=cdtype)
    return params


# --------------------------------------------------------------------------------------
# forward pass
# --------------------------------------------------------------------------------------
def decomposed_linear_apply(params, x, *, out_dtype=None, tb=None, tn=None, tm=None):
    """out = x @ W1.T @ W2.T + b, with prepared params.  x: [B, M] -> [B, N]."""
    B, M = x.shape
    assert M == params["M"]
    N = params["N"]
    cdtype = params["compute_dtype"]
    out_dtype = jnp.dtype(out_dtype) if out_dtype is not None else jnp.dtype(x.dtype)
    bpe = jnp.dtype(cdtype).itemsize
    obpe = out_dtype.itemsize

    xc = x.astype(cdtype)            # only per-forward prep; no zero-padding of x
    b = params["b"]

    # batch tile: fill MXU rows, keep >=2 "parallel" steps when possible (v7x megacore)
    sub_b = max(8, _sublane_multiple(cdtype), _sublane_multiple(out_dtype))
    if tb is None:
        tb = min(_round_up(B, sub_b), 256)
        if B >= 2 * sub_b:
            tb = min(tb, _round_up(-(-B // 2), sub_b))
    tb = max(sub_b, _round_up(tb, sub_b))
    grid_b = -(-B // tb)             # ragged B -> partial last tile, masked writes

    cap = _vmem_capacity_bytes()
    budget = int(cap * 0.7)

    if params["mode"] == "two_stage":
        # Genuinely low rank: both (small) factors stay resident and single-buffered.
        # TODO(synk): a fold=False layer whose factors exceed ~70% of VMEM would need an extra
        # N/K tiling axis; not implemented since low rank implies small factors.
        w1, w2 = params["w1"], params["w2"]
        Kp = w1.shape[1]
        est = (2 * tb * M * bpe                      # x block, double-buffered
               + (M * Kp + Kp * N) * bpe             # weights, single-buffered
               + N * 4                               # bias, single-buffered
               + 2 * tb * N * obpe                   # output block, double-buffered
               + tb * Kp * 4)                        # intermediate h
        vmem_limit = int(min(max(est + (4 << 20), 32 << 20), int(cap * 0.9)))
        return pl.pallas_call(
            _two_stage_kernel,
            out_shape=jax.ShapeDtypeStruct((B, N), out_dtype),
            grid=(grid_b,),
            in_specs=[
                pl.BlockSpec((tb, M), lambda i: (i, 0)),
                pl.BlockSpec((M, Kp), lambda i: (0, 0), pipeline_mode=pl.Buffered(1)),
                pl.BlockSpec((Kp, N), lambda i: (0, 0), pipeline_mode=pl.Buffered(1)),
                pl.BlockSpec((1, N), lambda i: (0, 0), pipeline_mode=pl.Buffered(1)),
            ],
            out_specs=pl.BlockSpec((tb, N), lambda i: (i, 0)),
            compiler_params=pltpu.CompilerParams(
                dimension_semantics=("parallel",),
                vmem_limit_bytes=vmem_limit,
            ),
        )(xc, w1, w2, b)

    # ---- fused (single effective weight) path ----
    w = params["w"]
    est_resident = 2 * tb * M * bpe + M * N * bpe + N * 4 + 2 * tb * N * obpe
    if tn is None and tm is None and est_resident <= budget:
        vmem_limit = int(min(max(est_resident + (4 << 20), 32 << 20), int(cap * 0.9)))
        return pl.pallas_call(
            _fused_resident_kernel,
            out_shape=jax.ShapeDtypeStruct((B, N), out_dtype),
            grid=(grid_b,),
            in_specs=[
                pl.BlockSpec((tb, M), lambda i: (i, 0)),
                pl.BlockSpec((M, N), lambda i: (0, 0), pipeline_mode=pl.Buffered(1)),
                pl.BlockSpec((1, N), lambda i: (0, 0), pipeline_mode=pl.Buffered(1)),
            ],
            out_specs=pl.BlockSpec((tb, N), lambda i: (i, 0)),
            compiler_params=pltpu.CompilerParams(
                dimension_semantics=("parallel",),
                vmem_limit_bytes=vmem_limit,
            ),
        )(xc, w, b)

    # Tiled fused path: weight never fully resident.  N axis is "parallel", M contraction axis
    # is "arbitrary" with an f32 VMEM accumulator.  Tile sizes can be passed per generation
    # (128-multiples on v5e, 256-multiples on v6e/v7x).
    if tn is None:
        tn = 256 if N >= 256 else N
    if tn != N:
        tn = _round_up(tn, 128)          # lane constraint; partial last N tile is write-masked
    if tm is None:
        tm = M
        for cand in (512, 256, 128):
            if M % cand == 0:
                tm = cand
                break
    assert tm == M or (tm % 128 == 0 and M % tm == 0), (
        "contraction tile must be a 128-multiple that divides M exactly")
    grid_n = -(-N // tn)
    grid_m = max(1, M // tm)

    est = (2 * tb * tm * bpe + 2 * tm * tn * bpe + 2 * tn * 4
           + 2 * tb * tn * obpe + tb * tn * 4)
    vmem_limit = int(min(max(est + (4 << 20), 32 << 20), int(cap * 0.9)))

    return pl.pallas_call(
        _fused_tiled_kernel,
        out_shape=jax.ShapeDtypeStruct((B, N), out_dtype),
        grid=(grid_b, grid_n, grid_m),
        in_specs=[
            pl.BlockSpec((tb, tm), lambda i, j, k: (i, k)),
            pl.BlockSpec((tm, tn), lambda i, j, k: (k, j)),
            pl.BlockSpec((1, tn), lambda i, j, k: (0, j)),
        ],
        out_specs=pl.BlockSpec((tb, tn), lambda i, j, k: (i, j)),
        scratch_shapes=[pltpu.VMEM((tb, tn), jnp.float32)],
        compiler_params=pltpu.CompilerParams(
            dimension_semantics=("parallel", "parallel", "arbitrary"),
            vmem_limit_bytes=vmem_limit,
        ),
    )(xc, w, b)


# --------------------------------------------------------------------------------------
# build the truncated-SVD factors the PyTorch module computes in __init__
# --------------------------------------------------------------------------------------
def build_decomposition(key, n, m, svd_sparsity):
    kw, kb = jax.random.split(key)
    bound = 1.0 / (m ** 0.5)
    W = jax.random.uniform(kw, (n, m), jnp.float32, -bound, bound)
    b = jax.random.uniform(kb, (n,), jnp.float32, -bound, bound)
    # TODO(synk): torch.linalg.svd in the module __init__ is host-side setup; done with
    # jnp.linalg.svd here (outside any Pallas kernel).
    U, S, V_t = jnp.linalg.svd(W, full_matrices=False)
    k = max(1, int((1.0 - svd_sparsity) * S.shape[0]))
    first_w = jnp.diag(S[:k]) @ V_t[:k, :]   # [k, m] == first.weight
    second_w = U[:, :k]                      # [n, k] == second.weight
    return W, b, first_w, second_w, b        # second_b == b


if __name__ == "__main__":
    key = jax.random.PRNGKey(0)
    kx, kparams, kx2, kw1, kw2, kb2 = jax.random.split(key, 6)

    # --- small shapes implied by the module: Linear(m=32 -> n=16), batch of 16, sparsity 0.5 ---
    B, M, N = 16, 32, 16
    svd_sparsity = 0.5
    _, _, first_w, second_w, second_b = build_decomposition(kparams, N, M, svd_sparsity)
    x = jax.random.normal(kx, (B, M), jnp.float32)

    # reference: exact PyTorch forward semantics  second(first(x))
    ref = (x @ first_w.T) @ second_w.T + second_b

    # 1) f32 compute, genuinely-low-rank two-matmul path (rank kept unpadded) -- tight tolerance
    p_two = prepare_decomposed_linear(first_w, second_w, second_b,
                                      compute_dtype=jnp.float32, fold=False)
    out = jax.block_until_ready(decomposed_linear_apply(p_two, x))
    assert out.shape == (B, N)
    assert jnp.allclose(out, ref, atol=1e-4, rtol=1e-4), float(jnp.max(jnp.abs(out - ref)))

    # 2) f32 compute, pre-folded single-matmul path -- tight tolerance
    p_fused = prepare_decomposed_linear(first_w, second_w, second_b,
                                        compute_dtype=jnp.float32, fold=True)
    out = jax.block_until_ready(decomposed_linear_apply(p_fused, x))
    assert jnp.allclose(out, ref, atol=1e-4, rtol=1e-4), float(jnp.max(jnp.abs(out - ref)))

    # 3) default path: bf16 compute (MXU-native), f32 accumulation -- looser tolerance
    p_bf16 = prepare_decomposed_linear(first_w, second_w, second_b)
    out = jax.block_until_ready(decomposed_linear_apply(p_bf16, x))
    assert out.shape == (B, N)
    assert jnp.allclose(out, ref, atol=3e-2, rtol=3e-2), float(jnp.max(jnp.abs(out - ref)))

    # 4) coverage of the tiled fused path (N + contraction axes, ragged batch): the configuration
    #    used when the weight cannot stay resident (e.g. large layers on v7x's 64 MiB VMEM)
    Bl, Ml, Nl, Kl = 50, 256, 384, 192
    bound = 1.0 / (Ml ** 0.5)
    fw = jax.random.uniform(kw1, (Kl, Ml), jnp.float32, -bound, bound)
    sw = jax.random.uniform(kw2, (Nl, Kl), jnp.float32, -bound, bound)
    sb = jax.random.uniform(kb2, (Nl,), jnp.float32, -bound, bound)
    xl = jax.random.normal(kx2, (Bl, Ml), jnp.float32)
    refl = (xl @ fw.T) @ sw.T + sb
    p_large = prepare_decomposed_linear(fw, sw, sb, compute_dtype=jnp.float32, fold=True)
    outl = jax.block_until_ready(decomposed_linear_apply(p_large, xl, tn=128, tm=128))
    assert outl.shape == (Bl, Nl)
    assert jnp.allclose(outl, refl, atol=5e-4, rtol=1e-4), float(jnp.max(jnp.abs(outl - refl)))

    print("KERNEL_OK")
</pallas_src>

<mosaic_0001>
module attributes {stable_mosaic.version = 11 : i64} {
  func.func @_two_stage_kernel(%arg0: i32, %arg1: memref<8x32xf32, #tpu.memory_space<vmem>>, %arg2: memref<32x8xf32, #tpu.memory_space<vmem>>, %arg3: memref<8x16xf32, #tpu.memory_space<vmem>>, %arg4: memref<1x16xf32, #tpu.memory_space<vmem>>, %arg5: memref<8x16xf32, #tpu.memory_space<vmem>>) attributes {dimension_semantics = [#tpu.dimension_semantics<parallel>], iteration_bounds = array<i64: 2>, scalar_prefetch = 0 : i64, scratch_operands = 0 : i64, tpu.core_type = #tpu.core_type<tc>, window_params = [{transform_indices = @transform_0, window_bounds = array<i64: 8, 32>}, {pipeline_mode = #tpu.pipeline_mode<synchronous>, transform_indices = @transform_1, window_bounds = array<i64: 32, 8>}, {pipeline_mode = #tpu.pipeline_mode<synchronous>, transform_indices = @transform_2, window_bounds = array<i64: 8, 16>}, {pipeline_mode = #tpu.pipeline_mode<synchronous>, transform_indices = @transform_3, window_bounds = array<i64: 1, 16>}, {transform_indices = @transform_4, window_bounds = array<i64: 8, 16>}]} {
    %c0 = arith.constant 0 : index
    %c0_0 = arith.constant 0 : index
    %0 = vector.load %arg1[%c0, %c0_0] : memref<8x32xf32, #tpu.memory_space<vmem>>, vector<8x32xf32>
    %c0_1 = arith.constant 0 : index
    %c0_2 = arith.constant 0 : index
    %1 = vector.load %arg2[%c0_1, %c0_2] : memref<32x8xf32, #tpu.memory_space<vmem>>, vector<32x8xf32>
    %cst = arith.constant dense<0.000000e+00> : vector<8x8xf32>
    %2 = tpu.matmul %0, %1, %cst {dimension_numbers = #tpu.dot_dimension_numbers<[1], [0], [0], [1], [0, 0, 1, 1], [], []>} : vector<8x32xf32>, vector<32x8xf32>, vector<8x8xf32> -> vector<8x8xf32>
    %c0_3 = arith.constant 0 : index
    %c0_4 = arith.constant 0 : index
    %3 = vector.load %arg3[%c0_3, %c0_4] : memref<8x16xf32, #tpu.memory_space<vmem>>, vector<8x16xf32>
    %cst_5 = arith.constant dense<0.000000e+00> : vector<8x16xf32>
    %4 = tpu.matmul %2, %3, %cst_5 {dimension_numbers = #tpu.dot_dimension_numbers<[1], [0], [0], [1], [0, 0, 1, 1], [], []>} : vector<8x8xf32>, vector<8x16xf32>, vector<8x16xf32> -> vector<8x16xf32>
    %c0_6 = arith.constant 0 : index
    %c0_7 = arith.constant 0 : index
    %5 = vector.load %arg4[%c0_6, %c0_7] : memref<1x16xf32, #tpu.memory_space<vmem>>, vector<1x16xf32>
    %6 = vector.broadcast %5 : vector<1x16xf32> to vector<8x16xf32>
    %7 = arith.addf %4, %6 : vector<8x16xf32>
    %c0_8 = arith.constant 0 : index
    %c0_9 = arith.constant 0 : index
    %8 = vector.load %arg5[%c0_8, %c0_9] : memref<8x16xf32, #tpu.memory_space<vmem>>, vector<8x16xf32>
    tpu.vector_store %arg5[%c0_8, %c0_9], %7 {strides = array<i32>} : memref<8x16xf32, #tpu.memory_space<vmem>>, vector<8x16xf32>,
    return
  }
  func.func @transform_0(%arg0: i32) -> (i32, i32) {
    %c0_i32 = arith.constant 0 : i32
    %c0_i32_0 = arith.constant 0 : i32
    return %arg0, %c0_i32 : i32, i32
  }
  func.func @transform_1(%arg0: i32) -> (i32, i32) {
    %c0_i32 = arith.constant 0 : i32
    %c0_i32_0 = arith.constant 0 : i32
    %c0_i32_1 = arith.constant 0 : i32
    return %c0_i32, %c0_i32_0 : i32, i32
  }
  func.func @transform_2(%arg0: i32) -> (i32, i32) {
    %c0_i32 = arith.constant 0 : i32
    %c0_i32_0 = arith.constant 0 : i32
    %c0_i32_1 = arith.constant 0 : i32
    return %c0_i32, %c0_i32_0 : i32, i32
  }
  func.func @transform_3(%arg0: i32) -> (i32, i32) {
    %c0_i32 = arith.constant 0 : i32
    %c0_i32_0 = arith.constant 0 : i32
    %c0_i32_1 = arith.constant 0 : i32
    return %c0_i32, %c0_i32_0 : i32, i32
  }
  func.func @transform_4(%arg0: i32) -> (i32, i32) {
    %c0_i32 = arith.constant 0 : i32
    %c0_i32_0 = arith.constant 0 : i32
    return %arg0, %c0_i32 : i32, i32
  }
}

</mosaic_0001>

<bundles_post_ra>
// kernel: tpu_custom_call.1
= control target key start
LH: loop header
LB: loop body
LE: loop exit
PB: predicated region body
PF: predicated region fallthrough
CT: control target
= control target key end

     0   :  { %9 = vsyncpa [#allocation3], 0  ;;  %s707_s0 = inlined_call_operand.vmem [shape: f32[16,32], index: 0, kind: input, shape index: {}]   ;;  %s708_s1 = inlined_call_operand.vmem [shape: f32[32,8], index: 1, kind: input, shape index: {}]   ;;  %s709_s2 = inlined_call_operand.vmem [shape: f32[8,16], index: 2, kind: input, shape index: {}]   ;;  %s710_s3 = inlined_call_operand.vmem [shape: f32[1,16], index: 3, kind: input, shape index: {}]   ;;  %s711_s4 = inlined_call_operand.hbm [shape: f32[16,16], index: 4, kind: output, shape index: {}]  }
   0x1   :  { %11 = vsyncpa [#allocation3 + $0x1], 0  ;;  %s596_s15 = smov 0   ;;  %s598_s16 = smov 0  }
   0x2   :  { %s600_s17 = smov 0   ;;  %s602_s18 = smov 0  }
   0x3 LB: > { %s617_s19 = sadd.s32 4294967295, %s566_s18   ;;  %s429_s20 = sadd.s32 4294967294, %s566_s18   ;;  %s566_s18 = sphi %s602_s18, %s717_s18   ;;  %s562_s17 = sphi %s600_s17, %s716_s17   ;;  %s558_s16 = sphi %s598_s16, %s715_s16   ;;  %s554_s15 = sphi %s596_s15, %s714_s15  }
   0x4   : > { %s621_s21 = sadd.s32 1, %s566_s18   ;;  %s113_s22 = sadd.s32 1, %s562_s17 }
   0x5   : > { %s110_s23 = ssub.s32 %s566_s18, %s621_s21  ;;  %p123_p0 = scmp.ne.s32.totalorder %s562_s17, %s558_s16 }
   0x6   : > { %p111_p1 = scmp.eq.s32.totalorder %s110_s23, 0  ;;  %p124_p2 = scmp.eq.s32.totalorder %s617_s19, 1 }
   0x7   : > { %p129_p3 = scmp.ne.s32.totalorder %s558_s16, %s554_s15  ;;  %p130_p4 = scmp.eq.s32.totalorder %s429_s20, 1 }
   0x8   : > { %s632_s24 = scalar_select %p111_p1, %s562_s17, %s113_s22  }
   0x9   : > { %p634_p5 = por %p124_p2, %p123_p0  ;;  %p638_p6 = por %p130_p4, %p129_p3 }
   0xa   : > { %p432_p7 = scmp.ge.s32.totalorder %s566_s18, 1  ;;  %p164_p8 = scmp.lt.s32.totalorder %s566_s18, 3 }
   0xc   : > { %p165_p9 = pnand %p432_p7, %p164_p8 }
   0xd   : > { %p189_p10 = scmp.lt.s32.totalorder (!%p165_p9), %s617_s19, 1  ;;  %s186_s22 = sand.u32 (!%p165_p9), 1, %s558_s16  }
   0xe   : > { %168 = sbr.rel (%p165_p9) target bundleno = 429 (0x1ad), region = 36  ;;  %s433_s23 = sshll.u32 (!%p165_p9), %s186_s22, 3 }
   0xf   : > { %s439_s29 = sshll.u32 (!%p165_p9), %s617_s19, 7  ;;  %s188_s30 = scalar_lea.vmem (!%p165_p9), [#allocation2], %s433_s23 }
  0x10   : > { %s357_s9 = scalar_lea.sflag (!%p165_p9), [#allocation3], %s186_s22 }
  0x13   : > { %v197_v0 = vld [vmem:[%s708_s1 + $0x18] sm:$0xff]  ;;  %v568_v1 = vmov 0.0   ;;  %v196_v2 = vld [vmem:[%s708_s1 + $0x10] sm:$0xff]  ;;  %vm569_vm0 = vmmov 0   ;;  %s190_s5 = scalar_select %p189_p10, %s617_s19, 1  ;;  %v195_v3 = vld [vmem:[%s708_s1 + $0x8] sm:$0xff] }
  0x14   : > { %449 = vmatprep.subr.mxu0 %v568_v1  ;;  %457 = vmatprep.mubr.msk.f32.mxu0 %vm569_vm0, %v568_v1  ;;  %v194_v4 = vld [vmem:[%s708_s1] sm:$0xff]  ;;  %vm198_vm1 = vcmask 261120   ;;  %vm280_vm2 = vcmask 64512   ;;  %vm354_vm3 = vcmask 130048   ;;  %s570_s19 = smov [#allocation2]  }
  0x15   : > { %450 = vmatpush3.msra.mxu0 %v197_v0  ;;  %460 = vmatprep.subr.mxu1 %v568_v1  ;;  %s434_s8 = sshll.u32 %s190_s5, 3  ;;  %v272_v6 = vld [vmem:[%s709_s2] sm:$0xff]  ;;  %s370_s5 = sshll.u32 %s188_s30, 4  ;;  %s371_s5 = int_to_ptr.vmem [resolvable:$true] %s370_s5 }
  0x16   : > { %451 = vmatprep.subr.mxu0 %v568_v1  ;;  %462 = vmatprep.mubr.msk.f32.mxu1 %vm569_vm0, %v568_v1  ;;  %s192_s13 = scalar_lea.vmem %s707_s0, %s434_s8  ;;  %v436_v9 = vld [vmem:[%s710_s3] ss:$0 sm:$0xff]  ;;  %s672_s8 = scalar_lea.hbm %s711_s4, %s439_s29 }
  0x17   : > { %452 = vmatpush3.msra.mxu0 %v196_v2  ;;  %v193_v5 = vld [vmem:[%s192_s13] sm:$0xff]  ;;  %461 = vmatpush3.msra.mxu1 %v272_v6  ;;  %s506_s10 = scalar_lea.vmem %s371_s5, 128  ;;  %s510_s11 = sshll.u32 %s570_s19, 4  ;;  %s511_s11 = int_to_ptr.vmem [resolvable:$false] %s510_s11 }
  0x18   : > { %453 = vmatprep.subr.mxu0 %v568_v1  ;;  %p507_p11 = scmp.ne.s32.totalorder %s371_s5, %s506_s10  ;;  %s512_s12 = scalar_lea.vmem %s511_s11, 256 }
  0x19   : > { %454 = vmatpush3.msra.mxu0 %v195_v3  ;;  %p513_p0 = scmp.lt.s32.totalorder %s371_s5, %s511_s11  ;;  %p514_p1 = scmp.lt.s32.totalorder %s512_s12, %s506_s10 }
  0x1a   : > { %455 = vmatprep.subr.mxu0 %v568_v1  ;;  %p508_p12 = pnand %p507_p11, %p634_p5 }
  0x1b   : > { %456 = vmatpush3.msra.mxu0 %v194_v4  ;;  %p515_p2 = por %p514_p1, %p513_p0 }
  0x1c   : > { %458 = vmatmul.mubr.msk.f32.vlgmr.msra.gmra.mxu0 %vm198_vm1, %v193_v5  ;;  %p509_p13 = pneg %p508_p12 }
  0x1e   : > { %p516_p3 = pnand %p515_p2, %p509_p13 }
  0xdc   : > { %v268_v7 = vpop.f32.mrf.mxu0 }
  0xdd   : > { %463 = vmatmul.mubr.msk.f32.vlgmr.msra.gmra.mxu1 %vm280_vm2, %v268_v7 }
  0xde   : > { %v459_v8 = vpop.f32.mrf.mxu0 }
 0x19d   : > { %v350_v10 = vpop.f32.mrf.mxu1 }
 0x19e   : > { %v351_v11 = vadd.f32 %v436_v9, %v350_v10 }
 0x19f   : > { %v464_v12 = vpop.f32.mrf.mxu1 }
 0x1a0   : > { %355 = vst.msk [vmem:[%s188_s30] sm:$0xff] %vm354_vm3, %v351_v11 }
 0x1a1   : > { %519 = shalt.err (!%p516_p3)
}
 0x1a2   : > { %s520_s13 = scalar_lea.hbm %s672_s8, 128  ;;  %s524_s22 = scalar_lea.hbm %s711_s4, 256 }
 0x1a3   : > { %p521_p4 = scmp.ne.s32.totalorder %s672_s8, %s520_s13  ;;  %p525_p9 = scmp.lt.s32.totalorder %s672_s8, %s711_s4 }
 0x1a4   : > { %p526_p10 = scmp.lt.s32.totalorder %s524_s22, %s520_s13 }
 0x1a5   : > { %p522_p7 = pnand %p521_p4, %p634_p5 }
 0x1a6   : > { %p527_p11 = por %p526_p10, %p525_p9 }
 0x1a7   : > { %p523_p8 = pneg %p522_p7 }
 0x1a9   : > { %p528_p12 = pnand %p527_p11, %p523_p8 }
 0x1ab   : > { %531 = shalt.err (!%p528_p12)
}
 0x1ac   : > { %465 = dma.vmem_to_hbm [thread:$0]  (%p634_p5), %s371_s5, 128, %s672_s8, %s357_s9  }
 0x1ad PF: > { %p471_p13 = scmp.ge.s32.totalorder %s566_s18, 2  ;;  %s382_s28 = sand.u32 1, %s554_s15  }
 0x1ae   : > { %s383_s29 = scalar_lea.sflag [#allocation3], %s382_s28 }
 0x1af   : > { %p468_p0 = pnand %p471_p13, %p638_p6 }
 0x1b1   : > { %p469_p1 = pneg %p468_p0 }
 0x1b3   : > { %549 = dma.done.wait (%p469_p1), %s383_s29, 128  }
 0x1b4   : > { %551 = vsyncadd (%p469_p1), %s383_s29, 4294967168  ;;  %p14_p2 = scmp.ge.s32.totalorder %s621_s21, 4   ;;  %s714_s15 = smov %s558_s16 }
 0x1b5   : > { %s715_s16 = smov %s562_s17  ;;  %s716_s17 = smov %s632_s24 }
 0x1b6   : > { %s717_s18 = smov %s621_s21  ;;  %16 = sbr.rel (!%p14_p2) target bundleno = 3 (0x3), region = 71 }
 0x1bb   :  { %388 = vsyncpa [#allocation3], 1 }
 0x1bc   :  { %390 = vsyncpa [#allocation3 + $0x1], 1 }

</bundles_post_ra>
